<compile_context>
chip_gen: v7x
topology: tpu7x:2x2x1
jax: 0.10.0
libtpu: 0.0.40
codegen_flags: <defaults>
</compile_context>

<pallas_src>
import functools

import jax
import jax.numpy as jnp
from jax.experimental import pallas as pl
from jax.experimental.pallas import tpu as pltpu

IN_DIM, HIDDEN, OUT_DIM = 56, 128, 28


def qnet_kernel(x_ref, w1_ref, b1_ref, w2_ref, b2_ref, o_ref):
    # x block arrives as raw f32; cast to bf16 in-kernel (cheap VPU work hidden
    # under the input DMA) so both matmuls run bf16 on the MXU with f32 acc.
    x = x_ref[...].astype(jnp.bfloat16)
    # fc1: (tb, 56) @ (56, 128) -> f32 (tb, 128)
    h = jnp.dot(x, w1_ref[...], preferred_element_type=jnp.float32)
    # bias + ReLU in f32 on the VPU (safe on v5e, which has no bf16 VPU).
    h = jnp.maximum(h + b1_ref[...], 0.0)
    # fc2: cast activations to bf16 once, (tb, 128) @ (128, 28) -> f32 (tb, 28)
    y = jnp.dot(h.astype(jnp.bfloat16), w2_ref[...],
                preferred_element_type=jnp.float32)
    # Narrow f32 store (28 cols = full array dim): 4.6x less writeback than a
    # 128-wide padded output.
    o_ref[...] = (y + b2_ref[...]).astype(o_ref.dtype)


def prepare_params(w1, b1, w2, b2):
    """One-time weight prep (bf16 matmul operands, f32 row-biases).

    Hoisted out of the forward path so it is not re-dispatched every call.
    """
    return (w1.astype(jnp.bfloat16),
            b1.reshape(1, HIDDEN).astype(jnp.float32),
            w2.astype(jnp.bfloat16),
            b2.reshape(1, OUT_DIM).astype(jnp.float32))


@functools.partial(jax.jit, static_argnames=("block_b",))
def qnet_forward(x, w1p, b1p, w2p, b2p, *, block_b=4096):
    """y = relu(x @ w1 + b1) @ w2 + b2  (matches torch QNet.forward).

    x: (B, 56) f32; w1p: (56, 128) bf16; b1p: (1, 128) f32;
    w2p: (128, 28) bf16; b2p: (1, 28) f32.  Returns (B, 28) f32.
    """
    B = x.shape[0]
    # Single full block when B fits (block = full array dims -> always legal);
    # otherwise block_b-row tiles (multiple of 8) with the trailing partial
    # block clipped by Pallas -- no explicit batch padding pass.
    tb = B if B <= block_b else block_b
    grid = pl.cdiv(B, tb)

    return pl.pallas_call(
        qnet_kernel,
        out_shape=jax.ShapeDtypeStruct((B, OUT_DIM), jnp.float32),
        grid=(grid,),
        in_specs=[
            pl.BlockSpec((tb, IN_DIM),      lambda i: (i, 0)),  # x: streamed over batch
            pl.BlockSpec((IN_DIM, HIDDEN),  lambda i: (0, 0)),  # w1: VMEM-resident
            pl.BlockSpec((1, HIDDEN),       lambda i: (0, 0)),  # b1: VMEM-resident
            pl.BlockSpec((HIDDEN, OUT_DIM), lambda i: (0, 0)),  # w2: VMEM-resident
            pl.BlockSpec((1, OUT_DIM),      lambda i: (0, 0)),  # b2: VMEM-resident
        ],
        out_specs=pl.BlockSpec((tb, OUT_DIM), lambda i: (i, 0)),
        compiler_params=pltpu.CompilerParams(
            # Batch rows are independent: megacore-shardable on v7x,
            # harmless elsewhere.  (No 2x expected -- kernel is HBM-bound.)
            dimension_semantics=("parallel",),
        ),
    )(x, w1p, b1p, w2p, b2p)


def qnet_ref(x, w1, b1, w2, b2):
    """Pure-JAX reference with the same bf16 rounding of matmul operands."""
    f32 = jnp.float32
    xb = x.astype(jnp.bfloat16).astype(f32)
    w1b = w1.astype(jnp.bfloat16).astype(f32)
    w2b = w2.astype(jnp.bfloat16).astype(f32)
    h = jnp.maximum(xb @ w1b + b1.reshape(1, -1), 0.0)
    hb = h.astype(jnp.bfloat16).astype(f32)
    return hb @ w2b + b2.reshape(1, -1)


def init_params(key, dtype=jnp.float32):
    """Deterministic init mimicking PyTorch nn.Linear (uniform +/- 1/sqrt(fan_in))."""
    k1, k2, k3, k4 = jax.random.split(key, 4)
    bound1 = 1.0 / jnp.sqrt(IN_DIM)
    bound2 = 1.0 / jnp.sqrt(HIDDEN)
    w1 = jax.random.uniform(k1, (IN_DIM, HIDDEN), dtype, -bound1, bound1)
    b1 = jax.random.uniform(k2, (1, HIDDEN), dtype, -bound1, bound1)
    w2 = jax.random.uniform(k3, (HIDDEN, OUT_DIM), dtype, -bound2, bound2)
    b2 = jax.random.uniform(k4, (1, OUT_DIM), dtype, -bound2, bound2)
    return w1, b1, w2, b2


if __name__ == "__main__":
    key = jax.random.PRNGKey(0)
    kx, kp = jax.random.split(key)
    w1, b1, w2, b2 = init_params(kp)
    w1p, b1p, w2p, b2p = prepare_params(w1, b1, w2, b2)   # one-time prep

    # B=8   : small demo batch, single full block.
    # B=1000: single full (non-multiple-of-8) block — full-array-dim BlockSpec path.
    # B=9000: multi-step grid (tb=4096) with a clipped ragged trailing block.
    for B in (8, 1000, 9000):
        x = jax.random.normal(jax.random.fold_in(kx, B), (B, IN_DIM), jnp.float32)
        out = qnet_forward(x, w1p, b1p, w2p, b2p)
        jax.block_until_ready(out)

        ref = qnet_ref(x, w1, b1, w2, b2)
        assert out.shape == (B, OUT_DIM)
        max_err = float(jnp.max(jnp.abs(out - ref)))
        assert jnp.allclose(out, ref, atol=1e-3, rtol=1e-3), (
            f"mismatch at B={B}: max abs err {max_err}")

    print("KERNEL_OK")
</pallas_src>

<mosaic_0001>
module attributes {stable_mosaic.version = 11 : i64} {
  func.func @qnet_kernel(%arg0: i32, %arg1: memref<8x56xf32, #tpu.memory_space<vmem>>, %arg2: memref<56x128xbf16, #tpu.memory_space<vmem>>, %arg3: memref<1x128xf32, #tpu.memory_space<vmem>>, %arg4: memref<128x28xbf16, #tpu.memory_space<vmem>>, %arg5: memref<1x28xf32, #tpu.memory_space<vmem>>, %arg6: memref<8x28xf32, #tpu.memory_space<vmem>>) attributes {dimension_semantics = [#tpu.dimension_semantics<parallel>], iteration_bounds = array<i64: 1>, scalar_prefetch = 0 : i64, scratch_operands = 0 : i64, tpu.core_type = #tpu.core_type<tc>, window_params = [{transform_indices = @transform_0, window_bounds = array<i64: 8, 56>}, {pipeline_mode = #tpu.pipeline_mode<synchronous>, transform_indices = @transform_1, window_bounds = array<i64: 56, 128>}, {pipeline_mode = #tpu.pipeline_mode<synchronous>, transform_indices = @transform_2, window_bounds = array<i64: 1, 128>}, {pipeline_mode = #tpu.pipeline_mode<synchronous>, transform_indices = @transform_3, window_bounds = array<i64: 128, 28>}, {pipeline_mode = #tpu.pipeline_mode<synchronous>, transform_indices = @transform_4, window_bounds = array<i64: 1, 28>}, {transform_indices = @transform_5, window_bounds = array<i64: 8, 28>}]} {
    %c0 = arith.constant 0 : index
    %c0_0 = arith.constant 0 : index
    %0 = vector.load %arg1[%c0, %c0_0] : memref<8x56xf32, #tpu.memory_space<vmem>>, vector<8x56xf32>
    %1 = arith.truncf %0 : vector<8x56xf32> to vector<8x56xbf16>
    %c0_1 = arith.constant 0 : index
    %c0_2 = arith.constant 0 : index
    %2 = vector.load %arg2[%c0_1, %c0_2] : memref<56x128xbf16, #tpu.memory_space<vmem>>, vector<56x128xbf16>
    %cst = arith.constant dense<0.000000e+00> : vector<8x128xf32>
    %3 = tpu.matmul %1, %2, %cst {dimension_numbers = #tpu.dot_dimension_numbers<[1], [0], [0], [1], [0, 0, 1, 1], [], []>} : vector<8x56xbf16>, vector<56x128xbf16>, vector<8x128xf32> -> vector<8x128xf32>
    %c0_3 = arith.constant 0 : index
    %c0_4 = arith.constant 0 : index
    %4 = vector.load %arg3[%c0_3, %c0_4] : memref<1x128xf32, #tpu.memory_space<vmem>>, vector<1x128xf32>
    %5 = vector.broadcast %4 : vector<1x128xf32> to vector<8x128xf32>
    %6 = arith.addf %3, %5 : vector<8x128xf32>
    %cst_5 = arith.constant 0.000000e+00 : f32
    %7 = vector.broadcast %cst_5 : f32 to vector<8x128xf32>
    %8 = arith.maximumf %6, %7 : vector<8x128xf32>
    %9 = arith.truncf %8 : vector<8x128xf32> to vector<8x128xbf16>
    %c0_6 = arith.constant 0 : index
    %c0_7 = arith.constant 0 : index
    %10 = vector.load %arg4[%c0_6, %c0_7] : memref<128x28xbf16, #tpu.memory_space<vmem>>, vector<128x28xbf16>
    %cst_8 = arith.constant dense<0.000000e+00> : vector<8x28xf32>
    %11 = tpu.matmul %9, %10, %cst_8 {dimension_numbers = #tpu.dot_dimension_numbers<[1], [0], [0], [1], [0, 0, 1, 1], [], []>} : vector<8x128xbf16>, vector<128x28xbf16>, vector<8x28xf32> -> vector<8x28xf32>
    %c0_9 = arith.constant 0 : index
    %c0_10 = arith.constant 0 : index
    %12 = vector.load %arg5[%c0_9, %c0_10] : memref<1x28xf32, #tpu.memory_space<vmem>>, vector<1x28xf32>
    %13 = vector.broadcast %12 : vector<1x28xf32> to vector<8x28xf32>
    %14 = arith.addf %11, %13 : vector<8x28xf32>
    %c0_11 = arith.constant 0 : index
    %c0_12 = arith.constant 0 : index
    %15 = vector.load %arg6[%c0_11, %c0_12] : memref<8x28xf32, #tpu.memory_space<vmem>>, vector<8x28xf32>
    tpu.vector_store %arg6[%c0_11, %c0_12], %14 {strides = array<i32>} : memref<8x28xf32, #tpu.memory_space<vmem>>, vector<8x28xf32>,
    return
  }
  func.func @transform_0(%arg0: i32) -> (i32, i32) {
    %c0_i32 = arith.constant 0 : i32
    %c0_i32_0 = arith.constant 0 : i32
    return %arg0, %c0_i32 : i32, i32
  }
  func.func @transform_1(%arg0: i32) -> (i32, i32) {
    %c0_i32 = arith.constant 0 : i32
    %c0_i32_0 = arith.constant 0 : i32
    %c0_i32_1 = arith.constant 0 : i32
    return %c0_i32, %c0_i32_0 : i32, i32
  }
  func.func @transform_2(%arg0: i32) -> (i32, i32) {
    %c0_i32 = arith.constant 0 : i32
    %c0_i32_0 = arith.constant 0 : i32
    %c0_i32_1 = arith.constant 0 : i32
    return %c0_i32, %c0_i32_0 : i32, i32
  }
  func.func @transform_3(%arg0: i32) -> (i32, i32) {
    %c0_i32 = arith.constant 0 : i32
    %c0_i32_0 = arith.constant 0 : i32
    %c0_i32_1 = arith.constant 0 : i32
    return %c0_i32, %c0_i32_0 : i32, i32
  }
  func.func @transform_4(%arg0: i32) -> (i32, i32) {
    %c0_i32 = arith.constant 0 : i32
    %c0_i32_0 = arith.constant 0 : i32
    %c0_i32_1 = arith.constant 0 : i32
    return %c0_i32, %c0_i32_0 : i32, i32
  }
  func.func @transform_5(%arg0: i32) -> (i32, i32) {
    %c0_i32 = arith.constant 0 : i32
    %c0_i32_0 = arith.constant 0 : i32
    return %arg0, %c0_i32 : i32, i32
  }
}

</mosaic_0001>

<bundles_post_ra>
// kernel: qnet_forward.1
= control target key start
LH: loop header
LB: loop body
LE: loop exit
PB: predicated region body
PF: predicated region fallthrough
CT: control target
= control target key end

     0   :  { %v336_v1 = vmov 0.0   ;;  %vm337_vm0 = vmmov 0   ;;  %vm63_vm1 = vcmask 1043456   ;;  %s426_s0 = inlined_call_operand.vmem [shape: f32[8,56], index: 0, kind: input, shape index: {}]   ;;  %s427_s1 = inlined_call_operand.vmem [shape: bf16[56,128], index: 1, kind: input, shape index: {}]   ;;  %s428_s2 = inlined_call_operand.vmem [shape: f32[1,128], index: 2, kind: input, shape index: {}]   ;;  %s429_s3 = inlined_call_operand.vmem [shape: bf16[128,28], index: 3, kind: input, shape index: {}]   ;;  %s430_s4 = inlined_call_operand.vmem [shape: f32[1,28], index: 4, kind: input, shape index: {}]   ;;  %s431_s5 = inlined_call_operand.hbm [shape: f32[8,28], index: 5, kind: output, shape index: {}]  }
   0x1   :  { %v300_v0 = vld [vmem:[%s427_s1] sm:$0xff]   ;;  %265 = vmatprep.subr.bf16.mxu0 %v336_v1  ;;  %277 = vmatprep.subr.bf16.mxu1 %v336_v1  ;;  %v301_v2 = vld [vmem:[%s427_s1 + $0x8] sm:$0xff]   ;;  %v302_v3 = vld [vmem:[%s427_s1 + $0x10] sm:$0xff]  }
   0x2   :  { %266 = vmatpush3.bf16.msra.mxu0 %v300_v0  ;;  %273 = vmatprep.mubr.msk.bf16.mxu0 %vm337_vm0, %v336_v1  ;;  %v304_v4 = vld [vmem:[%s429_s3] sm:$0xff]   ;;  %v303_v5 = vld [vmem:[%s427_s1 + $0x18] ss:$0 sps:$4 sm:$0xff]   ;;  %v305_v6 = vld [vmem:[%s429_s3 + $0x8] sm:$0xff]  }
   0x3   :  { %267 = vmatprep.subr.bf16.mxu0 %v336_v1  ;;  %293 = vmatprep.mubr.msk.bf16.mxu1 %vm337_vm0, %v336_v1  ;;  %v22_v7 = vld [vmem:[%s426_s0] sm:$0xff]  ;;  %v65_v8 = vsel %vm63_vm1, %v303_v5, 0  ;;  %v306_v9 = vld [vmem:[%s429_s3 + $0x10] sm:$0xff]  }
   0x4   :  { %278 = vmatpush3.bf16.msra.mxu1 %v304_v4 }
   0x5   :  { %279 = vmatprep.subr.bf16.mxu1 %v336_v1 }
   0x6   :  { %268 = vmatpush3.bf16.msra.mxu0 %v301_v2 }
   0x7   :  { %269 = vmatprep.subr.bf16.mxu0 %v336_v1 }
   0x8   :  { %280 = vmatpush3.bf16.msra.mxu1 %v305_v6 }
   0x9   :  { %281 = vmatprep.subr.bf16.mxu1 %v336_v1 }
   0xa   :  { %270 = vmatpush3.bf16.msra.mxu0 %v302_v3 }
   0xb   :  { %271 = vmatprep.subr.bf16.mxu0 %v336_v1 }
   0xc   :  { %10 = vsyncpa [#allocation3], 0  ;;  %v23_v10 = vpack.c.bf16 %v22_v7, %v22_v7  ;;  %vm59_vm2 = vcmask 457728   ;;  %282 = vmatpush3.bf16.msra.mxu1 %v306_v9  ;;  %v307_v11 = vld [vmem:[%s429_s3 + $0x18] sm:$0xff]   ;;  %v308_v12 = vld [vmem:[%s429_s3 + $0x20] sm:$0xff]   ;;  %s338_s21 = smov [#allocation2]  }
   0xd   :  { %283 = vmatprep.subr.bf16.mxu1 %v336_v1  ;;  %v309_v13 = vld [vmem:[%s429_s3 + $0x28] sm:$0xff]   ;;  %v310_v14 = vld [vmem:[%s429_s3 + $0x30] sm:$0xff]   ;;  %v311_v15 = vld [vmem:[%s429_s3 + $0x38] sm:$0xff]   ;;  %s228_s22 = sshll.u32 %s338_s21, 4  ;;  %vm220_vm3 = vcmask 228352   ;;  %s229_s22 = int_to_ptr.vmem [resolvable:$true] %s228_s22 }
   0xe   :  { %272 = vmatpush3.bf16.msra.mxu0 %v65_v8  ;;  %v236_v16 = vld [vmem:[%s428_s2] ss:$0 sm:$0xff]  ;;  %s312_s2 = scalar_lea.vmem %s229_s22, 128  ;;  %p317_p1 = scmp.lt.s32.totalorder %s229_s22, %s229_s22 }
   0xf   :  { %v242_v24 = vld [vmem:[%s430_s4] ss:$0 sm:$0xff]  ;;  %p313_p0 = scmp.ne.s32.totalorder %s229_s22, %s312_s2  ;;  %p318_p2 = scmp.lt.s32.totalorder %s312_s2, %s312_s2 }
  0x10   :  { %284 = vmatpush3.bf16.msra.mxu1 %v307_v11 }
  0x11   :  { %274 = vmatmul.mubr.msk.bf16.vlgmr.msra.gmra.mrb[0].mxu0 %vm59_vm2, %v23_v10  ;;  %285 = vmatprep.subr.bf16.mxu1 %v336_v1  ;;  %p319_p3 = por %p318_p2, %p317_p1 }
  0x13   :  { %p320_p4 = pnand %p319_p3, %p313_p0 }
  0x14   :  { %286 = vmatpush3.bf16.msra.mxu1 %v308_v12 }
  0x15   :  { %287 = vmatprep.subr.bf16.mxu1 %v336_v1 }
  0x18   :  { %288 = vmatpush3.bf16.msra.mxu1 %v309_v13 }
  0x19   :  { %289 = vmatprep.subr.bf16.mxu1 %v336_v1 }
  0x1c   :  { %290 = vmatpush3.bf16.msra.mxu1 %v310_v14 }
  0x1d   :  { %291 = vmatprep.subr.bf16.mxu1 %v336_v1 }
  0x20   :  { %292 = vmatpush3.bf16.msra.mxu1 %v311_v15 }
  0xe4   :  { %v101_v17 = vpop.f32.mrb[0].mxu0 }
  0xe5   :  { %v102_v18 = vadd.f32 %v236_v16, %v101_v17  ;;  %v275_v19 = vpop.f32.mrb[1].mxu0 }
  0xe6   :  { %v104_v20 = vpop.f32.mrb[2].mxu0 }
  0xe7   :  { %v107_v21 = vmax.f32 %v102_v18, 0.0  ;;  %v276_v22 = vpop.f32.mrb[3].mxu0 }
  0xe9   :  { %v108_v23 = vpack.c.bf16 %v107_v21, %v107_v21 }
  0xeb   :  { %294 = vmatmul.mubr.bf16.vlgmr.msra.gmra.mrb[0].mxu1 %v108_v23 }
 0x1be   :  { %v214_v25 = vpop.f32.mrb[0].mxu1 }
 0x1bf   :  { %v215_v26 = vadd.f32 %v242_v24, %v214_v25  ;;  %v295_v27 = vpop.f32.mrb[1].mxu1 }
 0x1c0   :  { %v217_v28 = vpop.f32.mrb[2].mxu1 }
 0x1c1   :  { %v296_v29 = vpop.f32.mrb[3].mxu1  ;;  %221 = vst.msk [vmem:[#allocation2] sm:$0xff] %vm220_vm3, %v215_v26 }
 0x1c2   :  { %323 = shalt.err (!%p320_p4)
}
 0x1c3   :  { %s324_s4 = scalar_lea.hbm %s431_s5, 128 }
 0x1c4   :  { %p325_p5 = scmp.ne.s32.totalorder %s431_s5, %s324_s4  ;;  %p328_p6 = scmp.lt.u32.totalorder %s324_s4, %s431_s5 }
 0x1c6   :  { %p330_p7 = pnand %p328_p6, %p325_p5 }
 0x1c8   :  { %333 = shalt.err (!%p330_p7)
}
 0x1c9   :  { %231 = dma.vmem_to_hbm [thread:$0]  %s229_s22, 128, %s431_s5, [#allocation3]  }
 0x1ca   :  { %334 = dma.done.wait [#allocation3], 128  }
 0x1cb   :  { %335 = vsyncadd [#allocation3], 4294967168 }
 0x1cc   :  { %235 = vsyncpa [#allocation3], 1 }

</bundles_post_ra>
